<compile_context>
chip_gen: v7x
topology: tpu7x:2x2x1
jax: 0.10.0
libtpu: 0.0.40
codegen_flags: <defaults>
</compile_context>

<pallas_src>
import functools

import jax
import jax.numpy as jnp
from jax import lax
from jax.experimental import pallas as pl
from jax.experimental.pallas import tpu as pltpu

_LANES = 128
_SUBLANES = 8


def _loss_dsc_fake_kernel(x_ref, out_ref, acc_ref, *, tile_rows,
                          tiles_per_split, rows_valid, need_mask):
    i = pl.program_id(1)

    # Reset the per-split vector accumulator at the start of the reduction axis.
    @pl.when(i == 0)
    def _():
        acc_ref[...] = jnp.zeros_like(acc_ref)

    x = x_ref[...].astype(jnp.float32)          # native-dtype HBM read, cast in-kernel
    val = jnp.maximum(x + 1.0, 0.0)             # relu(1 + x)

    if need_mask:
        # Zero out rows past the real extent (edge blocks contain garbage).
        t = pl.program_id(0) * tiles_per_split + i
        row_start = t * tile_rows
        row_ids = lax.broadcasted_iota(jnp.int32, val.shape, 0)
        val = jnp.where(row_start + row_ids < rows_valid, val, 0.0)

    # Fold the tile down to one vreg worth of partial sums (pure VPU adds).
    acc_ref[...] += jnp.sum(
        val.reshape(tile_rows // _SUBLANES, _SUBLANES, _LANES), axis=0)

    # Finalize: single cross-sublane reduce, lane-dense (1, 128) store.
    @pl.when(i == pl.num_programs(1) - 1)
    def _():
        out_ref[...] = jnp.sum(acc_ref[...], axis=0, keepdims=True)


def loss_dsc_fake(rhat: jax.Array, *, tile_rows: int = 1024) -> jax.Array:
    """mean(relu(1 + rhat)) computed with a Pallas TPU kernel."""
    n_elems = rhat.size
    if n_elems == 0:
        # torch.mean of an empty tensor is NaN
        return jnp.float32(jnp.nan)

    flat = rhat.reshape(-1)
    rem = n_elems % _LANES
    if rem:
        # Tiny (<128 elem) pad only; -1 fill contributes relu(1 - 1) == 0.
        flat = jnp.concatenate(
            [flat, jnp.full((_LANES - rem,), -1, dtype=flat.dtype)])
    rows = flat.shape[0] // _LANES
    x2d = flat.reshape(rows, _LANES)

    # Effective tile: as large as requested but never (much) larger than the data.
    rows_rounded = ((rows + _SUBLANES - 1) // _SUBLANES) * _SUBLANES
    tile_rows_eff = max(_SUBLANES, min(tile_rows, rows_rounded))
    tile_rows_eff = (tile_rows_eff // _SUBLANES) * _SUBLANES

    tiles_total = pl.cdiv(rows, tile_rows_eff)
    # Two splits shard the reduction across TensorCores on v7x; on 1-TC chips
    # (v5e/v6e) the "parallel" axis just iterates serially — harmless.
    n_splits = 2 if tiles_total >= 2 else 1
    tiles_per_split = pl.cdiv(tiles_total, n_splits)

    # Mask only if the grid over-covers the real rows (statically decided).
    need_mask = (n_splits * tiles_per_split * tile_rows_eff) != rows

    kernel = functools.partial(
        _loss_dsc_fake_kernel,
        tile_rows=tile_rows_eff,
        tiles_per_split=tiles_per_split,
        rows_valid=rows,
        need_mask=need_mask,
    )

    def in_index_map(s, i):
        t = s * tiles_per_split + i
        # Clamp so grid-tail steps never request a fully out-of-bounds block;
        # their contribution is zeroed by the in-kernel mask.
        return (jnp.minimum(t, tiles_total - 1), 0)

    out = pl.pallas_call(
        kernel,
        out_shape=jax.ShapeDtypeStruct((n_splits, _LANES), jnp.float32),
        grid_spec=pltpu.PrefetchScalarGridSpec(
            num_scalar_prefetch=0,
            grid=(n_splits, tiles_per_split),
            in_specs=[pl.BlockSpec((tile_rows_eff, _LANES), in_index_map)],
            out_specs=pl.BlockSpec((1, _LANES), lambda s, i: (s, 0)),
            scratch_shapes=[pltpu.VMEM((_SUBLANES, _LANES), jnp.float32)],
        ),
        compiler_params=pltpu.CompilerParams(
            dimension_semantics=("parallel", "arbitrary"),
        ),
    )(x2d)

    # Tiny final reduce over (n_splits, 128) partials + mean scale.
    return jnp.sum(out) * (1.0 / float(n_elems))


def _ref(x):
    return jnp.mean(jnp.maximum(1.0 + x.astype(jnp.float32), 0.0))


if __name__ == "__main__":
    key = jax.random.PRNGKey(0)

    # Main test: discriminator-style output map [B, C, H, W].
    rhat = jax.random.normal(key, (2, 4, 16, 16), dtype=jnp.float32)
    loss = jax.block_until_ready(loss_dsc_fake(rhat))
    assert jnp.allclose(loss, _ref(rhat), atol=1e-5, rtol=1e-5), (loss, _ref(rhat))

    # Exercise the two-split ("parallel") path with small tiles.
    loss2 = jax.block_until_ready(loss_dsc_fake(rhat, tile_rows=8))
    assert jnp.allclose(loss2, _ref(rhat), atol=1e-5, rtol=1e-5), (loss2, _ref(rhat))

    # Exercise native bf16 read + lane pad + in-kernel tail mask.
    k1, k2 = jax.random.split(key)
    rhat_bf16 = jax.random.normal(k1, (2, 3, 19, 23), dtype=jnp.bfloat16)
    loss3 = jax.block_until_ready(loss_dsc_fake(rhat_bf16))
    assert jnp.allclose(loss3, _ref(rhat_bf16), atol=1e-4, rtol=1e-4), (loss3, _ref(rhat_bf16))

    # Exercise two splits + uneven tiles + clamped grid-tail block.
    loss4 = jax.block_until_ready(loss_dsc_fake(rhat_bf16, tile_rows=8))
    assert jnp.allclose(loss4, _ref(rhat_bf16), atol=1e-4, rtol=1e-4), (loss4, _ref(rhat_bf16))

    # Moderate multi-tile f32 case.
    rhat_big = jax.random.normal(k2, (8, 8, 32, 32), dtype=jnp.float32)
    loss5 = jax.block_until_ready(loss_dsc_fake(rhat_big, tile_rows=64))
    assert jnp.allclose(loss5, _ref(rhat_big), atol=1e-5, rtol=1e-5), (loss5, _ref(rhat_big))

    print("KERNEL_OK")
</pallas_src>

<mosaic_0001>
module attributes {stable_mosaic.version = 11 : i64} {
  func.func @_loss_dsc_fake_kernel(%arg0: i32, %arg1: i32, %arg2: memref<16x128xf32, #tpu.memory_space<vmem>>, %arg3: memref<1x128xf32, #tpu.memory_space<vmem>>, %arg4: memref<8x128xf32, #tpu.memory_space<vmem>>) attributes {dimension_semantics = [#tpu.dimension_semantics<parallel>, #tpu.dimension_semantics<arbitrary>], iteration_bounds = array<i64: 1, 1>, scalar_prefetch = 0 : i64, scratch_operands = 1 : i64, tpu.core_type = #tpu.core_type<tc>, window_params = [{transform_indices = @transform_0, window_bounds = array<i64: 16, 128>}, {transform_indices = @transform_1, window_bounds = array<i64: 1, 128>}]} {
    %c0_i32 = arith.constant 0 : i32
    %0 = arith.cmpi eq, %arg1, %c0_i32 : i32
    %1 = arith.extui %0 : i1 to i32
    %c0_i32_0 = arith.constant 0 : i32
    %2 = arith.cmpi ne, %1, %c0_i32_0 : i32
    scf.if %2 {
      %cst_10 = arith.constant 0.000000e+00 : f32
      %16 = vector.broadcast %cst_10 : f32 to vector<8x128xf32>
      %c0_11 = arith.constant 0 : index
      %c0_12 = arith.constant 0 : index
      %17 = vector.load %arg4[%c0_11, %c0_12] : memref<8x128xf32, #tpu.memory_space<vmem>>, vector<8x128xf32>
      tpu.vector_store %arg4[%c0_11, %c0_12], %16 {strides = array<i32>} : memref<8x128xf32, #tpu.memory_space<vmem>>, vector<8x128xf32>,
    } else {
    }
    %c0 = arith.constant 0 : index
    %c0_1 = arith.constant 0 : index
    %3 = vector.load %arg2[%c0, %c0_1] : memref<16x128xf32, #tpu.memory_space<vmem>>, vector<16x128xf32>
    %cst = arith.constant 1.000000e+00 : f32
    %4 = vector.broadcast %cst : f32 to vector<16x128xf32>
    %5 = arith.addf %3, %4 : vector<16x128xf32>
    %cst_2 = arith.constant 0.000000e+00 : f32
    %6 = vector.broadcast %cst_2 : f32 to vector<16x128xf32>
    %7 = arith.maximumf %5, %6 : vector<16x128xf32>
    %c0_3 = arith.constant 0 : index
    %c0_4 = arith.constant 0 : index
    %8 = vector.load %arg4[%c0_3, %c0_4] : memref<8x128xf32, #tpu.memory_space<vmem>>, vector<8x128xf32>
    %9 = vector.shape_cast %7 : vector<16x128xf32> to vector<2x8x128xf32>
    %cst_5 = arith.constant dense<0.000000e+00> : vector<8x128xf32>
    %10 = vector.multi_reduction <add>, %9, %cst_5 [0] : vector<2x8x128xf32> to vector<8x128xf32>
    %11 = arith.addf %8, %10 : vector<8x128xf32>
    %c0_6 = arith.constant 0 : index
    %c0_7 = arith.constant 0 : index
    %12 = vector.load %arg4[%c0_6, %c0_7] : memref<8x128xf32, #tpu.memory_space<vmem>>, vector<8x128xf32>
    tpu.vector_store %arg4[%c0_6, %c0_7], %11 {strides = array<i32>} : memref<8x128xf32, #tpu.memory_space<vmem>>, vector<8x128xf32>,
    %c0_i32_8 = arith.constant 0 : i32
    %13 = arith.cmpi eq, %arg1, %c0_i32_8 : i32
    %14 = arith.extui %13 : i1 to i32
    %c0_i32_9 = arith.constant 0 : i32
    %15 = arith.cmpi ne, %14, %c0_i32_9 : i32
    scf.if %15 {
      %c0_10 = arith.constant 0 : index
      %c0_11 = arith.constant 0 : index
      %16 = vector.load %arg4[%c0_10, %c0_11] : memref<8x128xf32, #tpu.memory_space<vmem>>, vector<8x128xf32>
      %cst_12 = arith.constant dense<0.000000e+00> : vector<128xf32>
      %17 = vector.multi_reduction <add>, %16, %cst_12 [0] : vector<8x128xf32> to vector<128xf32>
      %18 = vector.shape_cast %17 : vector<128xf32> to vector<1x128xf32>
      %c0_13 = arith.constant 0 : index
      %c0_14 = arith.constant 0 : index
      %19 = vector.load %arg3[%c0_13, %c0_14] : memref<1x128xf32, #tpu.memory_space<vmem>>, vector<1x128xf32>
      tpu.vector_store %arg3[%c0_13, %c0_14], %18 {strides = array<i32>} : memref<1x128xf32, #tpu.memory_space<vmem>>, vector<1x128xf32>,
    } else {
    }
    return
  }
  func.func @transform_0(%arg0: i32, %arg1: i32) -> (i32, i32) {
    %c1_i32 = arith.constant 1 : i32
    %0 = arith.muli %arg0, %c1_i32 : i32
    %1 = arith.addi %0, %arg1 : i32
    %c0_i32 = arith.constant 0 : i32
    %2 = arith.minsi %1, %c0_i32 : i32
    %c0_i32_0 = arith.constant 0 : i32
    %c0_i32_1 = arith.constant 0 : i32
    return %2, %c0_i32_0 : i32, i32
  }
  func.func @transform_1(%arg0: i32, %arg1: i32) -> (i32, i32) {
    %c0_i32 = arith.constant 0 : i32
    %c0_i32_0 = arith.constant 0 : i32
    return %arg0, %c0_i32 : i32, i32
  }
}

</mosaic_0001>

<bundles_post_ra>
// kernel: tpu_custom_call.1
= control target key start
LH: loop header
LB: loop body
LE: loop exit
PB: predicated region body
PF: predicated region fallthrough
CT: control target
= control target key end

     0   :  { %6 = vsyncpa [#allocation4], 0  ;;  %s166_s0 = inlined_call_operand.hbm [shape: f32[16,128], index: 0, kind: input, shape index: {}]   ;;  %s167_s1 = inlined_call_operand.hbm [shape: f32[1,128], index: 1, kind: output, shape index: {}]  }
   0x1   :  { %7 = vsyncpa [#allocation5], 0  ;;  %s128_s6 = smov [#allocation3]   ;;  %s80_s10 = scalar_lea.hbm %s166_s0, 256 }
   0x2   :  { %s19_s7 = sshll.u32 %s128_s6, 4  ;;  %p81_p0 = scmp.ne.s32.totalorder %s166_s0, %s80_s10  ;;  %s20_s7 = int_to_ptr.vmem [resolvable:$true] %s19_s7 }
   0x3   :  { %p84_p1 = scmp.lt.u32.totalorder %s80_s10, %s166_s0 }
   0x5   :  { %p86_p2 = pnand %p84_p1, %p81_p0 }
   0x7   :  { %89 = shalt.err (!%p86_p2)
}
   0x8   :  { %s90_s15 = scalar_lea.vmem %s20_s7, 256  ;;  %p95_p4 = scmp.lt.s32.totalorder %s20_s7, %s20_s7 }
   0x9   :  { %p91_p3 = scmp.ne.s32.totalorder %s20_s7, %s90_s15  ;;  %p96_p5 = scmp.lt.s32.totalorder %s90_s15, %s90_s15 }
   0xb   :  { %p97_p6 = por %p96_p5, %p95_p4 }
   0xd   :  { %p98_p7 = pnand %p97_p6, %p91_p3 }
   0xf   :  { %101 = shalt.err (!%p98_p7)
}
  0x10   :  { %s129_s16 = smov 128   ;;  %s130_s17 = smov 8  }
  0x11   :  { %25 = dma.hbm_to_vmem [thread:$0]  %s166_s0, 256, %s20_s7, [#allocation4], %s129_s16, %s129_s16, %s130_s17  }
  0x12   :  { %124 = dma.done.wait [#allocation4], 256  }
  0x13   :  { %125 = vsyncadd [#allocation4], 4294967040  ;;  %v38_v0 = vld [vmem:[#allocation3] sm:$0xff]  ;;  %v39_v1 = vld [vmem:[#allocation3 + $0x8] sm:$0xff]  ;;  %s131_s20 = smov [#allocation6]  }
  0x14   :  { %v40_v2 = vadd.f32 1.0, %v38_v0  ;;  %v41_v3 = vadd.f32 1.0, %v39_v1  ;;  %s65_s21 = sshll.u32 %s131_s20, 4  ;;  %s66_s21 = int_to_ptr.vmem [resolvable:$true] %s65_s21 }
  0x15   :  { %s102_s0 = scalar_lea.vmem %s66_s21, 16  ;;  %s106_s22 = scalar_lea.vmem %s66_s21, 32 }
  0x16   :  { %v42_v4 = vmax.f32 %v40_v2, 0.0  ;;  %v43_v5 = vmax.f32 %v41_v3, 0.0  ;;  %p103_p8 = scmp.ne.s32.totalorder %s66_s21, %s102_s0  ;;  %p107_p9 = scmp.lt.s32.totalorder %s66_s21, %s66_s21 }
  0x17   :  { %p108_p10 = scmp.lt.s32.totalorder %s106_s22, %s102_s0 }
  0x18   :  { %v45_v6 = vadd.f32 %v43_v5, %v42_v4 }
  0x19   :  { %p109_p11 = por %p108_p10, %p107_p9 }
  0x1a   :  { %v52_v7 = vrot.slane %v45_v6, 4 }
  0x1b   :  { %p110_p12 = pnand %p109_p11, %p103_p8 }
  0x1c   :  { %v53_v8 = vadd.f32 %v52_v7, %v45_v6 }
  0x1e   :  { %v54_v9 = vrot.slane %v53_v8, 2 }
  0x20   :  { %v55_v10 = vadd.f32 %v54_v9, %v53_v8 }
  0x22   :  { %v56_v11 = vrot.slane %v55_v10, 1 }
  0x24   :  { %v57_v12 = vadd.f32 %v56_v11, %v55_v10 }
  0x26   :  { %58 = vst [vmem:[#allocation6] sm:$0x1] %v57_v12 }
  0x27   :  { %113 = shalt.err (!%p110_p12)
}
  0x28   :  { %s114_s25 = scalar_lea.hbm %s167_s1, 16 }
  0x29   :  { %p115_p13 = scmp.ne.s32.totalorder %s167_s1, %s114_s25  ;;  %p118_p0 = scmp.lt.u32.totalorder %s114_s25, %s167_s1 }
  0x2b   :  { %p120_p1 = pnand %p118_p0, %p115_p13 }
  0x2d   :  { %123 = shalt.err (!%p120_p1)
}
  0x2e   :  { %68 = dma.vmem_to_hbm [thread:$0]  %s66_s21, 16, %s167_s1, [#allocation5]  }
  0x2f   :  { %126 = dma.done.wait [#allocation5], 16  }
  0x30   :  { %127 = vsyncadd [#allocation5], 4294967280 }
  0x31   :  { %72 = vsyncpa [#allocation4], 1 }
  0x32   :  { %73 = vsyncpa [#allocation5], 1 }

</bundles_post_ra>
